<compile_context>
chip_gen: v7x
topology: tpu7x:2x2x1
jax: 0.10.0
libtpu: 0.0.40
codegen_flags: <defaults>
</compile_context>

<pallas_src>
import functools

import jax
import jax.numpy as jnp
from jax.experimental import pallas as pl
from jax.experimental.pallas import tpu as pltpu


def _resblock_kernel(x_ref, w1_ref, w2_ref, b1_ref, b2_ref, mask_ref, out_ref,
                     stack_ref, *, W, C1, CPAD):
    """Fused ResBlock forward for one group of folded batch elements.

    x_ref    : (1, C1, L)      input plane, lanes = flattened (batch, y, x)
    w1_ref   : (C1, 9*CPAD)    bf16 conv1 weights, tap-major, BN-scaled
    w2_ref   : (C2, 9*CPAD)    bf16 conv2 weights, tap-major, BN-scaled
    b1_ref   : (C1, 1)         folded BN bias (conv1), f32
    b2_ref   : (C2, 1)         folded BN bias (conv2), f32
    mask_ref : (9, C1, L)      per-tap validity masks (pre-broadcast), f32
    out_ref  : (1, C2, L)
    stack_ref: (9*CPAD, L) f32 scratch: tap-stacked im2col operand; tap t
                               occupies rows [t*CPAD, t*CPAD + C1).
    """
    L = x_ref.shape[-1]

    # Zero the scratch once: the CPAD-C1 pad rows of each tap slot only ever
    # meet zero weight columns in the matmul, but must not hold NaN/Inf VMEM
    # garbage (NaN * 0 = NaN).
    stack_ref[...] = jnp.zeros_like(stack_ref)

    def conv3x3(inp, w_ref):
        # Per tap: shift the flat spatial axis with an XLU roll (otherwise
        # idle slot), zero invalid border/wraparound lanes with the
        # precomputed mask (f32 VPU math -> v5e-safe), and park the tap in
        # its tile-aligned scratch slot.
        for t in range(9):                      # static unroll
            dy, dx = t // 3 - 1, t % 3 - 1
            if dy == 0 and dx == 0:
                tap = inp                       # center tap: no shift, mask==1
            else:
                shift = (-(dy * W + dx)) % L    # wrap over the folded lane axis
                tap = pltpu.roll(inp, shift, axis=1) * mask_ref[t]
            stack_ref[t * CPAD:t * CPAD + C1, :] = tap
        # One fused (Cout, 9*CPAD) @ (9*CPAD, L) bf16 MXU matmul, f32 acc.
        return jnp.dot(w_ref[...], stack_ref[...].astype(jnp.bfloat16),
                       preferred_element_type=jnp.float32)

    x = x_ref[0]                                # (C1, L) f32
    # conv1 (BN scale folded into w1) + bias + ReLU
    y1 = jnp.maximum(conv3x3(x, w1_ref) + b1_ref[...], 0.0)
    # conv2 (BN scale folded into w2) + bias, no activation
    y2 = conv3x3(y1, w2_ref) + b2_ref[...]
    # identity shortcut (stride == 1, C1 == C2) + final ReLU; lane-dense store
    out_ref[0] = jnp.maximum(y2 + x, 0.0).astype(out_ref.dtype)


def _tensorcores_per_device() -> int:
    """Best-effort TensorCores per JAX device (2 on megacore v4/v5p/v7x)."""
    try:
        kind = jax.devices()[0].device_kind.lower()
    except Exception:
        return 1
    return 2 if any(tag in kind for tag in ("v7", "v4", "v5p")) else 1


def _pack_conv_weights(w_hwio, scale, cpad):
    """(KH,KW,Cin,Cout) * per-Cout BN scale -> (Cout, KH*KW*cpad) bf16,
    tap-major with zero-padded tap slots (a single dense VMEM tile)."""
    kh, kw, cin, cout = w_hwio.shape
    w = jnp.transpose(w_hwio * scale, (3, 0, 1, 2)).reshape(cout, kh * kw, cin)
    w = jnp.pad(w, ((0, 0), (0, 0), (0, cpad - cin)))
    return w.reshape(cout, kh * kw * cpad).astype(jnp.bfloat16)


def resblock_forward(x_nchw, w1_hwio, w2_hwio, s1, b1, s2, b2, *, groups=None):
    """ResBlock forward. x_nchw: (N, C1, H, W) float32. Returns (N, C2, H, W)."""
    N, C1, H, W = x_nchw.shape
    C2 = w2_hwio.shape[-1]
    assert C1 == C2, "identity shortcut requires c1 == c2 when stride == 1"
    HW = H * W
    CPAD = -(-C1 // 8) * 8          # full 8-sublane (f32) slot per tap

    # Grid groups: 1 on single-TC chips (fold the whole batch into one grid
    # step -> one ~0.35us step + one DMA round total); #TensorCores on
    # megacore chips so the "parallel" grid axis feeds both cores.
    if groups is None:
        groups = _tensorcores_per_device()
    groups = max(1, min(int(groups), N))
    while N % groups:
        groups -= 1
    NB = N // groups                # batch elements folded per grid step
    L = NB * HW                     # lane extent (lane-dense)

    # (N, C1, H, W) -> (groups, C1, NB*HW): channel-planar, batch folded onto
    # lanes.  Tiny one-off transpose done by XLA outside the kernel.
    x_fold = (x_nchw.reshape(groups, NB, C1, HW)
              .transpose(0, 2, 1, 3).reshape(groups, C1, L))

    # Fold BN scale into the conv weights; pack lane-dense, tap-major, bf16.
    w1_packed = _pack_conv_weights(w1_hwio, s1, CPAD)     # (C1, 9*CPAD)
    w2_packed = _pack_conv_weights(w2_hwio, s2, CPAD)     # (C2, 9*CPAD)
    b1c = b1.reshape(C1, 1).astype(jnp.float32)
    b2c = b2.reshape(C2, 1).astype(jnp.float32)

    # Per-tap validity masks for the roll-based SAME (zero) padding,
    # pre-broadcast over channels and the folded batch -> no in-kernel
    # broadcast, one contiguous DMA.  Cross-image wraparound from the roll is
    # covered because it only hits masked border positions (3x3, stride 1).
    ys = jnp.arange(HW, dtype=jnp.int32) // W
    xs = jnp.arange(HW, dtype=jnp.int32) % W
    valid = []
    for t in range(9):
        dy, dx = t // 3 - 1, t % 3 - 1
        valid.append((ys + dy >= 0) & (ys + dy < H) &
                     (xs + dx >= 0) & (xs + dx < W))
    valid9 = jnp.stack(valid).astype(jnp.float32)                 # (9, HW)
    masks = jnp.broadcast_to(valid9[:, None, None, :], (9, C1, NB, HW))
    masks = masks.reshape(9, C1, L)

    out_fold = pl.pallas_call(
        functools.partial(_resblock_kernel, W=W, C1=C1, CPAD=CPAD),
        out_shape=jax.ShapeDtypeStruct((groups, C2, L), jnp.float32),
        grid_spec=pltpu.PrefetchScalarGridSpec(
            num_scalar_prefetch=0,
            grid=(groups,),
            in_specs=[
                pl.BlockSpec((1, C1, L), lambda g: (g, 0, 0)),
                pl.BlockSpec((C1, 9 * CPAD), lambda g: (0, 0)),
                pl.BlockSpec((C2, 9 * CPAD), lambda g: (0, 0)),
                pl.BlockSpec((C1, 1), lambda g: (0, 0)),
                pl.BlockSpec((C2, 1), lambda g: (0, 0)),
                pl.BlockSpec((9, C1, L), lambda g: (0, 0, 0)),
            ],
            out_specs=pl.BlockSpec((1, C2, L), lambda g: (g, 0, 0)),
            scratch_shapes=[pltpu.VMEM((9 * CPAD, L), jnp.float32)],
        ),
        compiler_params=pltpu.CompilerParams(
            dimension_semantics=("parallel",)),
    )(x_fold, w1_packed, w2_packed, b1c, b2c, masks)

    # (groups, C2, NB*HW) -> (N, C2, H, W)
    return (out_fold.reshape(groups, C2, NB, HW)
            .transpose(0, 2, 1, 3).reshape(N, C2, H, W))


def reference_forward(x_nchw, w1_hwio, w2_hwio, s1, b1, s2, b2):
    """Pure-JAX reference (lax.conv, f32) for correctness checking."""
    x = jnp.transpose(x_nchw, (0, 2, 3, 1))
    conv = functools.partial(
        jax.lax.conv_general_dilated,
        window_strides=(1, 1), padding="SAME",
        dimension_numbers=("NHWC", "HWIO", "NHWC"))
    y1 = jnp.maximum(conv(x, w1_hwio) * s1 + b1, 0.0)
    y2 = conv(y1, w2_hwio) * s2 + b2
    out = jnp.maximum(y2 + x, 0.0)
    return jnp.transpose(out, (0, 3, 1, 2))


def _kaiming_uniform(key, shape, fan_in):
    bound = (6.0 / fan_in) ** 0.5  # gain=sqrt(2) for relu, kaiming uniform
    return jax.random.uniform(key, shape, jnp.float32, -bound, bound)


if __name__ == "__main__":
    # ResBlock(c1=4, c2=4, poolsize=3, stride=1) on a (2, 4, 16, 16) input.
    N, C1, C2, H, W, K = 2, 4, 4, 16, 16, 3
    EPS = 1e-5

    key = jax.random.PRNGKey(0)
    ks = jax.random.split(key, 8)

    x = jax.random.normal(ks[0], (N, C1, H, W), jnp.float32)

    # Conv weights in HWIO (KH, KW, Cin, Cout), kaiming-uniform like PyTorch.
    w1 = _kaiming_uniform(ks[1], (K, K, C1, C1), fan_in=C1 * K * K)
    w2 = _kaiming_uniform(ks[2], (K, K, C1, C2), fan_in=C1 * K * K)

    # BatchNorm (eval mode) parameters, folded to per-channel scale/bias.
    g1 = 1.0 + 0.1 * jax.random.normal(ks[3], (C1,), jnp.float32)
    be1 = 0.1 * jax.random.normal(ks[4], (C1,), jnp.float32)
    g2 = 1.0 + 0.1 * jax.random.normal(ks[5], (C2,), jnp.float32)
    be2 = 0.1 * jax.random.normal(ks[6], (C2,), jnp.float32)
    rm1 = jnp.zeros((C1,), jnp.float32); rv1 = jnp.ones((C1,), jnp.float32)
    rm2 = jnp.zeros((C2,), jnp.float32); rv2 = jnp.ones((C2,), jnp.float32)

    s1 = g1 / jnp.sqrt(rv1 + EPS)
    b1 = be1 - rm1 * s1
    s2 = g2 / jnp.sqrt(rv2 + EPS)
    b2 = be2 - rm2 * s2

    fwd = jax.jit(resblock_forward)
    out = jax.block_until_ready(fwd(x, w1, w2, s1, b1, s2, b2))

    ref = reference_forward(x, w1, w2, s1, b1, s2, b2)
    assert out.shape == (N, C2, H, W)
    # MXU operands are bf16 (f32 accumulation), so the tolerance against the
    # f32 lax.conv reference is loosened accordingly (bf16 ~8 mantissa bits).
    assert jnp.allclose(out, ref, atol=5e-2, rtol=2e-2), "mismatch vs reference"

    print("KERNEL_OK")
</pallas_src>

<mosaic_0001>
module attributes {stable_mosaic.version = 11 : i64} {
  func.func @_resblock_kernel(%arg0: i32, %arg1: memref<1x4x512xf32, #tpu.memory_space<vmem>>, %arg2: memref<4x72xbf16, #tpu.memory_space<vmem>>, %arg3: memref<4x72xbf16, #tpu.memory_space<vmem>>, %arg4: memref<4x1xf32, #tpu.memory_space<vmem>>, %arg5: memref<4x1xf32, #tpu.memory_space<vmem>>, %arg6: memref<9x4x512xf32, #tpu.memory_space<vmem>>, %arg7: memref<1x4x512xf32, #tpu.memory_space<vmem>>, %arg8: memref<72x512xf32, #tpu.memory_space<vmem>>) attributes {dimension_semantics = [#tpu.dimension_semantics<parallel>], iteration_bounds = array<i64: 1>, scalar_prefetch = 0 : i64, scratch_operands = 1 : i64, tpu.core_type = #tpu.core_type<tc>, window_params = [{transform_indices = @transform_0, window_bounds = array<i64: 1, 4, 512>}, {pipeline_mode = #tpu.pipeline_mode<synchronous>, transform_indices = @transform_1, window_bounds = array<i64: 4, 72>}, {pipeline_mode = #tpu.pipeline_mode<synchronous>, transform_indices = @transform_2, window_bounds = array<i64: 4, 72>}, {pipeline_mode = #tpu.pipeline_mode<synchronous>, transform_indices = @transform_3, window_bounds = array<i64: 4, 1>}, {pipeline_mode = #tpu.pipeline_mode<synchronous>, transform_indices = @transform_4, window_bounds = array<i64: 4, 1>}, {pipeline_mode = #tpu.pipeline_mode<synchronous>, transform_indices = @transform_5, window_bounds = array<i64: 9, 4, 512>}, {transform_indices = @transform_6, window_bounds = array<i64: 1, 4, 512>}]} {
    %cst = arith.constant 0.000000e+00 : f32
    %0 = vector.broadcast %cst : f32 to vector<72x512xf32>
    %c0 = arith.constant 0 : index
    %c0_0 = arith.constant 0 : index
    %1 = vector.load %arg8[%c0, %c0_0] : memref<72x512xf32, #tpu.memory_space<vmem>>, vector<72x512xf32>
    tpu.vector_store %arg8[%c0, %c0_0], %0 {strides = array<i32>} : memref<72x512xf32, #tpu.memory_space<vmem>>, vector<72x512xf32>,
    %c0_1 = arith.constant 0 : index
    %c0_2 = arith.constant 0 : index
    %c0_3 = arith.constant 0 : index
    %2 = vector.load %arg1[%c0_1, %c0_2, %c0_3] : memref<1x4x512xf32, #tpu.memory_space<vmem>>, vector<1x4x512xf32>
    %3 = vector.shape_cast %2 : vector<1x4x512xf32> to vector<4x512xf32>
    %c17_i32 = arith.constant 17 : i32
    %4 = tpu.dynamic_rotate %3 by %c17_i32 dim 1 : vector<4x512xf32>, i32 -> vector<4x512xf32>
    %c0_4 = arith.constant 0 : index
    %c0_5 = arith.constant 0 : index
    %c0_6 = arith.constant 0 : index
    %5 = vector.load %arg6[%c0_4, %c0_5, %c0_6] : memref<9x4x512xf32, #tpu.memory_space<vmem>>, vector<1x4x512xf32>
    %6 = vector.shape_cast %5 : vector<1x4x512xf32> to vector<4x512xf32>
    %7 = arith.mulf %4, %6 : vector<4x512xf32>
    %c0_7 = arith.constant 0 : index
    %c0_8 = arith.constant 0 : index
    %8 = vector.load %arg8[%c0_7, %c0_8] : memref<72x512xf32, #tpu.memory_space<vmem>>, vector<4x512xf32>
    tpu.vector_store %arg8[%c0_7, %c0_8], %7 {strides = array<i32>} : memref<72x512xf32, #tpu.memory_space<vmem>>, vector<4x512xf32>,
    %c16_i32 = arith.constant 16 : i32
    %9 = tpu.dynamic_rotate %3 by %c16_i32 dim 1 : vector<4x512xf32>, i32 -> vector<4x512xf32>
    %c1 = arith.constant 1 : index
    %c0_9 = arith.constant 0 : index
    %c0_10 = arith.constant 0 : index
    %10 = vector.load %arg6[%c1, %c0_9, %c0_10] : memref<9x4x512xf32, #tpu.memory_space<vmem>>, vector<1x4x512xf32>
    %11 = vector.shape_cast %10 : vector<1x4x512xf32> to vector<4x512xf32>
    %12 = arith.mulf %9, %11 : vector<4x512xf32>
    %c8 = arith.constant 8 : index
    %c0_11 = arith.constant 0 : index
    %13 = vector.load %arg8[%c8, %c0_11] : memref<72x512xf32, #tpu.memory_space<vmem>>, vector<4x512xf32>
    tpu.vector_store %arg8[%c8, %c0_11], %12 {strides = array<i32>} : memref<72x512xf32, #tpu.memory_space<vmem>>, vector<4x512xf32>,
    %c15_i32 = arith.constant 15 : i32
    %14 = tpu.dynamic_rotate %3 by %c15_i32 dim 1 : vector<4x512xf32>, i32 -> vector<4x512xf32>
    %c2 = arith.constant 2 : index
    %c0_12 = arith.constant 0 : index
    %c0_13 = arith.constant 0 : index
    %15 = vector.load %arg6[%c2, %c0_12, %c0_13] : memref<9x4x512xf32, #tpu.memory_space<vmem>>, vector<1x4x512xf32>
    %16 = vector.shape_cast %15 : vector<1x4x512xf32> to vector<4x512xf32>
    %17 = arith.mulf %14, %16 : vector<4x512xf32>
    %c16 = arith.constant 16 : index
    %c0_14 = arith.constant 0 : index
    %18 = vector.load %arg8[%c16, %c0_14] : memref<72x512xf32, #tpu.memory_space<vmem>>, vector<4x512xf32>
    tpu.vector_store %arg8[%c16, %c0_14], %17 {strides = array<i32>} : memref<72x512xf32, #tpu.memory_space<vmem>>, vector<4x512xf32>,
    %c1_i32 = arith.constant 1 : i32
    %19 = tpu.dynamic_rotate %3 by %c1_i32 dim 1 : vector<4x512xf32>, i32 -> vector<4x512xf32>
    %c3 = arith.constant 3 : index
    %c0_15 = arith.constant 0 : index
    %c0_16 = arith.constant 0 : index
    %20 = vector.load %arg6[%c3, %c0_15, %c0_16] : memref<9x4x512xf32, #tpu.memory_space<vmem>>, vector<1x4x512xf32>
    %21 = vector.shape_cast %20 : vector<1x4x512xf32> to vector<4x512xf32>
    %22 = arith.mulf %19, %21 : vector<4x512xf32>
    %c24 = arith.constant 24 : index
    %c0_17 = arith.constant 0 : index
    %23 = vector.load %arg8[%c24, %c0_17] : memref<72x512xf32, #tpu.memory_space<vmem>>, vector<4x512xf32>
    tpu.vector_store %arg8[%c24, %c0_17], %22 {strides = array<i32>} : memref<72x512xf32, #tpu.memory_space<vmem>>, vector<4x512xf32>,
    %c32 = arith.constant 32 : index
    %c0_18 = arith.constant 0 : index
    %24 = vector.load %arg8[%c32, %c0_18] : memref<72x512xf32, #tpu.memory_space<vmem>>, vector<4x512xf32>
    tpu.vector_store %arg8[%c32, %c0_18], %3 {strides = array<i32>} : memref<72x512xf32, #tpu.memory_space<vmem>>, vector<4x512xf32>,
    %c511_i32 = arith.constant 511 : i32
    %25 = tpu.dynamic_rotate %3 by %c511_i32 dim 1 : vector<4x512xf32>, i32 -> vector<4x512xf32>
    %c5 = arith.constant 5 : index
    %c0_19 = arith.constant 0 : index
    %c0_20 = arith.constant 0 : index
    %26 = vector.load %arg6[%c5, %c0_19, %c0_20] : memref<9x4x512xf32, #tpu.memory_space<vmem>>, vector<1x4x512xf32>
    %27 = vector.shape_cast %26 : vector<1x4x512xf32> to vector<4x512xf32>
    %28 = arith.mulf %25, %27 : vector<4x512xf32>
    %c40 = arith.constant 40 : index
    %c0_21 = arith.constant 0 : index
    %29 = vector.load %arg8[%c40, %c0_21] : memref<72x512xf32, #tpu.memory_space<vmem>>, vector<4x512xf32>
    tpu.vector_store %arg8[%c40, %c0_21], %28 {strides = array<i32>} : memref<72x512xf32, #tpu.memory_space<vmem>>, vector<4x512xf32>,
    %c497_i32 = arith.constant 497 : i32
    %30 = tpu.dynamic_rotate %3 by %c497_i32 dim 1 : vector<4x512xf32>, i32 -> vector<4x512xf32>
    %c6 = arith.constant 6 : index
    %c0_22 = arith.constant 0 : index
    %c0_23 = arith.constant 0 : index
    %31 = vector.load %arg6[%c6, %c0_22, %c0_23] : memref<9x4x512xf32, #tpu.memory_space<vmem>>, vector<1x4x512xf32>
    %32 = vector.shape_cast %31 : vector<1x4x512xf32> to vector<4x512xf32>
    %33 = arith.mulf %30, %32 : vector<4x512xf32>
    %c48 = arith.constant 48 : index
    %c0_24 = arith.constant 0 : index
    %34 = vector.load %arg8[%c48, %c0_24] : memref<72x512xf32, #tpu.memory_space<vmem>>, vector<4x512xf32>
    tpu.vector_store %arg8[%c48, %c0_24], %33 {strides = array<i32>} : memref<72x512xf32, #tpu.memory_space<vmem>>, vector<4x512xf32>,
    %c496_i32 = arith.constant 496 : i32
    %35 = tpu.dynamic_rotate %3 by %c496_i32 dim 1 : vector<4x512xf32>, i32 -> vector<4x512xf32>
    %c7 = arith.constant 7 : index
    %c0_25 = arith.constant 0 : index
    %c0_26 = arith.constant 0 : index
    %36 = vector.load %arg6[%c7, %c0_25, %c0_26] : memref<9x4x512xf32, #tpu.memory_space<vmem>>, vector<1x4x512xf32>
    %37 = vector.shape_cast %36 : vector<1x4x512xf32> to vector<4x512xf32>
    %38 = arith.mulf %35, %37 : vector<4x512xf32>
    %c56 = arith.constant 56 : index
    %c0_27 = arith.constant 0 : index
    %39 = vector.load %arg8[%c56, %c0_27] : memref<72x512xf32, #tpu.memory_space<vmem>>, vector<4x512xf32>
    tpu.vector_store %arg8[%c56, %c0_27], %38 {strides = array<i32>} : memref<72x512xf32, #tpu.memory_space<vmem>>, vector<4x512xf32>,
    %c495_i32 = arith.constant 495 : i32
    %40 = tpu.dynamic_rotate %3 by %c495_i32 dim 1 : vector<4x512xf32>, i32 -> vector<4x512xf32>
    %c8_28 = arith.constant 8 : index
    %c0_29 = arith.constant 0 : index
    %c0_30 = arith.constant 0 : index
    %41 = vector.load %arg6[%c8_28, %c0_29, %c0_30] : memref<9x4x512xf32, #tpu.memory_space<vmem>>, vector<1x4x512xf32>
    %42 = vector.shape_cast %41 : vector<1x4x512xf32> to vector<4x512xf32>
    %43 = arith.mulf %40, %42 : vector<4x512xf32>
    %c64 = arith.constant 64 : index
    %c0_31 = arith.constant 0 : index
    %44 = vector.load %arg8[%c64, %c0_31] : memref<72x512xf32, #tpu.memory_space<vmem>>, vector<4x512xf32>
    tpu.vector_store %arg8[%c64, %c0_31], %43 {strides = array<i32>} : memref<72x512xf32, #tpu.memory_space<vmem>>, vector<4x512xf32>,
    %c0_32 = arith.constant 0 : index
    %c0_33 = arith.constant 0 : index
    %45 = vector.load %arg2[%c0_32, %c0_33] : memref<4x72xbf16, #tpu.memory_space<vmem>>, vector<4x72xbf16>
    %c0_34 = arith.constant 0 : index
    %c0_35 = arith.constant 0 : index
    %46 = vector.load %arg8[%c0_34, %c0_35] : memref<72x512xf32, #tpu.memory_space<vmem>>, vector<72x512xf32>
    %47 = arith.truncf %46 : vector<72x512xf32> to vector<72x512xbf16>
    %cst_36 = arith.constant dense<0.000000e+00> : vector<4x512xf32>
    %48 = tpu.matmul %45, %47, %cst_36 {dimension_numbers = #tpu.dot_dimension_numbers<[1], [0], [0], [1], [0, 0, 1, 1], [], []>} : vector<4x72xbf16>, vector<72x512xbf16>, vector<4x512xf32> -> vector<4x512xf32>
    %c0_37 = arith.constant 0 : index
    %c0_38 = arith.constant 0 : index
    %49 = vector.load %arg4[%c0_37, %c0_38] : memref<4x1xf32, #tpu.memory_space<vmem>>, vector<4x1xf32>
    %50 = vector.broadcast %49 : vector<4x1xf32> to vector<4x512xf32>
    %51 = arith.addf %48, %50 : vector<4x512xf32>
    %cst_39 = arith.constant 0.000000e+00 : f32
    %52 = vector.broadcast %cst_39 : f32 to vector<4x512xf32>
    %53 = arith.maximumf %51, %52 : vector<4x512xf32>
    %c17_i32_40 = arith.constant 17 : i32
    %54 = tpu.dynamic_rotate %53 by %c17_i32_40 dim 1 : vector<4x512xf32>, i32 -> vector<4x512xf32>
    %c0_41 = arith.constant 0 : index
    %c0_42 = arith.constant 0 : index
    %c0_43 = arith.constant 0 : index
    %55 = vector.load %arg6[%c0_41, %c0_42, %c0_43] : memref<9x4x512xf32, #tpu.memory_space<vmem>>, vector<1x4x512xf32>
    %56 = vector.shape_cast %55 : vector<1x4x512xf32> to vector<4x512xf32>
    %57 = arith.mulf %54, %56 : vector<4x512xf32>
    %c0_44 = arith.constant 0 : index
    %c0_45 = arith.constant 0 : index
    %58 = vector.load %arg8[%c0_44, %c0_45] : memref<72x512xf32, #tpu.memory_space<vmem>>, vector<4x512xf32>
    tpu.vector_store %arg8[%c0_44, %c0_45], %57 {strides = array<i32>} : memref<72x512xf32, #tpu.memory_space<vmem>>, vector<4x512xf32>,
    %c16_i32_46 = arith.constant 16 : i32
    %59 = tpu.dynamic_rotate %53 by %c16_i32_46 dim 1 : vector<4x512xf32>, i32 -> vector<4x512xf32>
    %c1_47 = arith.constant 1 : index
    %c0_48 = arith.constant 0 : index
    %c0_49 = arith.constant 0 : index
    %60 = vector.load %arg6[%c1_47, %c0_48, %c0_49] : memref<9x4x512xf32, #tpu.memory_space<vmem>>, vector<1x4x512xf32>
    %61 = vector.shape_cast %60 : vector<1x4x512xf32> to vector<4x512xf32>
    %62 = arith.mulf %59, %61 : vector<4x512xf32>
    %c8_50 = arith.constant 8 : index
    %c0_51 = arith.constant 0 : index
    %63 = vector.load %arg8[%c8_50, %c0_51] : memref<72x512xf32, #tpu.memory_space<vmem>>, vector<4x512xf32>
    tpu.vector_store %arg8[%c8_50, %c0_51], %62 {strides = array<i32>} : memref<72x512xf32, #tpu.memory_space<vmem>>, vector<4x512xf32>,
    %c15_i32_52 = arith.constant 15 : i32
    %64 = tpu.dynamic_rotate %53 by %c15_i32_52 dim 1 : vector<4x512xf32>, i32 -> vector<4x512xf32>
    %c2_53 = arith.constant 2 : index
    %c0_54 = arith.constant 0 : index
    %c0_55 = arith.constant 0 : index
    %65 = vector.load %arg6[%c2_53, %c0_54, %c0_55] : memref<9x4x512xf32, #tpu.memory_space<vmem>>, vector<1x4x512xf32>
    %66 = vector.shape_cast %65 : vector<1x4x512xf32> to vector<4x512xf32>
    %67 = arith.mulf %64, %66 : vector<4x512xf32>
    %c16_56 = arith.constant 16 : index
    %c0_57 = arith.constant 0 : index
    %68 = vector.load %arg8[%c16_56, %c0_57] : memref<72x512xf32, #tpu.memory_space<vmem>>, vector<4x512xf32>
    tpu.vector_store %arg8[%c16_56, %c0_57], %67 {strides = array<i32>} : memref<72x512xf32, #tpu.memory_space<vmem>>, vector<4x512xf32>,
    %c1_i32_58 = arith.constant 1 : i32
    %69 = tpu.dynamic_rotate %53 by %c1_i32_58 dim 1 : vector<4x512xf32>, i32 -> vector<4x512xf32>
    %c3_59 = arith.constant 3 : index
    %c0_60 = arith.constant 0 : index
    %c0_61 = arith.constant 0 : index
    %70 = vector.load %arg6[%c3_59, %c0_60, %c0_61] : memref<9x4x512xf32, #tpu.memory_space<vmem>>, vector<1x4x512xf32>
    %71 = vector.shape_cast %70 : vector<1x4x512xf32> to vector<4x512xf32>
    %72 = arith.mulf %69, %71 : vector<4x512xf32>
    %c24_62 = arith.constant 24 : index
    %c0_63 = arith.constant 0 : index
    %73 = vector.load %arg8[%c24_62, %c0_63] : memref<72x512xf32, #tpu.memory_space<vmem>>, vector<4x512xf32>
    tpu.vector_store %arg8[%c24_62, %c0_63], %72 {strides = array<i32>} : memref<72x512xf32, #tpu.memory_space<vmem>>, vector<4x512xf32>,
    %c32_64 = arith.constant 32 : index
    %c0_65 = arith.constant 0 : index
    %74 = vector.load %arg8[%c32_64, %c0_65] : memref<72x512xf32, #tpu.memory_space<vmem>>, vector<4x512xf32>
    tpu.vector_store %arg8[%c32_64, %c0_65], %53 {strides = array<i32>} : memref<72x512xf32, #tpu.memory_space<vmem>>, vector<4x512xf32>,
    %c511_i32_66 = arith.constant 511 : i32
    %75 = tpu.dynamic_rotate %53 by %c511_i32_66 dim 1 : vector<4x512xf32>, i32 -> vector<4x512xf32>
    %c5_67 = arith.constant 5 : index
    %c0_68 = arith.constant 0 : index
    %c0_69 = arith.constant 0 : index
    %76 = vector.load %arg6[%c5_67, %c0_68, %c0_69] : memref<9x4x512xf32, #tpu.memory_space<vmem>>, vector<1x4x512xf32>
    %77 = vector.shape_cast %76 : vector<1x4x512xf32> to vector<4x512xf32>
    %78 = arith.mulf %75, %77 : vector<4x512xf32>
    %c40_70 = arith.constant 40 : index
    %c0_71 = arith.constant 0 : index
    %79 = vector.load %arg8[%c40_70, %c0_71] : memref<72x512xf32, #tpu.memory_space<vmem>>, vector<4x512xf32>
    tpu.vector_store %arg8[%c40_70, %c0_71], %78 {strides = array<i32>} : memref<72x512xf32, #tpu.memory_space<vmem>>, vector<4x512xf32>,
    %c497_i32_72 = arith.constant 497 : i32
    %80 = tpu.dynamic_rotate %53 by %c497_i32_72 dim 1 : vector<4x512xf32>, i32 -> vector<4x512xf32>
    %c6_73 = arith.constant 6 : index
    %c0_74 = arith.constant 0 : index
    %c0_75 = arith.constant 0 : index
    %81 = vector.load %arg6[%c6_73, %c0_74, %c0_75] : memref<9x4x512xf32, #tpu.memory_space<vmem>>, vector<1x4x512xf32>
    %82 = vector.shape_cast %81 : vector<1x4x512xf32> to vector<4x512xf32>
    %83 = arith.mulf %80, %82 : vector<4x512xf32>
    %c48_76 = arith.constant 48 : index
    %c0_77 = arith.constant 0 : index
    %84 = vector.load %arg8[%c48_76, %c0_77] : memref<72x512xf32, #tpu.memory_space<vmem>>, vector<4x512xf32>
    tpu.vector_store %arg8[%c48_76, %c0_77], %83 {strides = array<i32>} : memref<72x512xf32, #tpu.memory_space<vmem>>, vector<4x512xf32>,
    %c496_i32_78 = arith.constant 496 : i32
    %85 = tpu.dynamic_rotate %53 by %c496_i32_78 dim 1 : vector<4x512xf32>, i32 -> vector<4x512xf32>
    %c7_79 = arith.constant 7 : index
    %c0_80 = arith.constant 0 : index
    %c0_81 = arith.constant 0 : index
    %86 = vector.load %arg6[%c7_79, %c0_80, %c0_81] : memref<9x4x512xf32, #tpu.memory_space<vmem>>, vector<1x4x512xf32>
    %87 = vector.shape_cast %86 : vector<1x4x512xf32> to vector<4x512xf32>
    %88 = arith.mulf %85, %87 : vector<4x512xf32>
    %c56_82 = arith.constant 56 : index
    %c0_83 = arith.constant 0 : index
    %89 = vector.load %arg8[%c56_82, %c0_83] : memref<72x512xf32, #tpu.memory_space<vmem>>, vector<4x512xf32>
    tpu.vector_store %arg8[%c56_82, %c0_83], %88 {strides = array<i32>} : memref<72x512xf32, #tpu.memory_space<vmem>>, vector<4x512xf32>,
    %c495_i32_84 = arith.constant 495 : i32
    %90 = tpu.dynamic_rotate %53 by %c495_i32_84 dim 1 : vector<4x512xf32>, i32 -> vector<4x512xf32>
    %c8_85 = arith.constant 8 : index
    %c0_86 = arith.constant 0 : index
    %c0_87 = arith.constant 0 : index
    %91 = vector.load %arg6[%c8_85, %c0_86, %c0_87] : memref<9x4x512xf32, #tpu.memory_space<vmem>>, vector<1x4x512xf32>
    %92 = vector.shape_cast %91 : vector<1x4x512xf32> to vector<4x512xf32>
    %93 = arith.mulf %90, %92 : vector<4x512xf32>
    %c64_88 = arith.constant 64 : index
    %c0_89 = arith.constant 0 : index
    %94 = vector.load %arg8[%c64_88, %c0_89] : memref<72x512xf32, #tpu.memory_space<vmem>>, vector<4x512xf32>
    tpu.vector_store %arg8[%c64_88, %c0_89], %93 {strides = array<i32>} : memref<72x512xf32, #tpu.memory_space<vmem>>, vector<4x512xf32>,
    %c0_90 = arith.constant 0 : index
    %c0_91 = arith.constant 0 : index
    %95 = vector.load %arg3[%c0_90, %c0_91] : memref<4x72xbf16, #tpu.memory_space<vmem>>, vector<4x72xbf16>
    %c0_92 = arith.constant 0 : index
    %c0_93 = arith.constant 0 : index
    %96 = vector.load %arg8[%c0_92, %c0_93] : memref<72x512xf32, #tpu.memory_space<vmem>>, vector<72x512xf32>
    %97 = arith.truncf %96 : vector<72x512xf32> to vector<72x512xbf16>
    %cst_94 = arith.constant dense<0.000000e+00> : vector<4x512xf32>
    %98 = tpu.matmul %95, %97, %cst_94 {dimension_numbers = #tpu.dot_dimension_numbers<[1], [0], [0], [1], [0, 0, 1, 1], [], []>} : vector<4x72xbf16>, vector<72x512xbf16>, vector<4x512xf32> -> vector<4x512xf32>
    %c0_95 = arith.constant 0 : index
    %c0_96 = arith.constant 0 : index
    %99 = vector.load %arg5[%c0_95, %c0_96] : memref<4x1xf32, #tpu.memory_space<vmem>>, vector<4x1xf32>
    %100 = vector.broadcast %99 : vector<4x1xf32> to vector<4x512xf32>
    %101 = arith.addf %98, %100 : vector<4x512xf32>
    %102 = arith.addf %101, %3 : vector<4x512xf32>
    %cst_97 = arith.constant 0.000000e+00 : f32
    %103 = vector.broadcast %cst_97 : f32 to vector<4x512xf32>
    %104 = arith.maximumf %102, %103 : vector<4x512xf32>
    %c0_98 = arith.constant 0 : index
    %c0_99 = arith.constant 0 : index
    %c0_100 = arith.constant 0 : index
    %105 = vector.load %arg7[%c0_98, %c0_99, %c0_100] : memref<1x4x512xf32, #tpu.memory_space<vmem>>, vector<1x4x512xf32>
    %106 = vector.shape_cast %105 : vector<1x4x512xf32> to vector<4x512xf32>
    %107 = vector.shape_cast %104 : vector<4x512xf32> to vector<1x4x512xf32>
    tpu.vector_store %arg7[%c0_98, %c0_99, %c0_100], %107 {strides = array<i32>} : memref<1x4x512xf32, #tpu.memory_space<vmem>>, vector<1x4x512xf32>,
    return
  }
  func.func @transform_0(%arg0: i32) -> (i32, i32, i32) {
    %c0_i32 = arith.constant 0 : i32
    %c0_i32_0 = arith.constant 0 : i32
    %c0_i32_1 = arith.constant 0 : i32
    return %arg0, %c0_i32, %c0_i32_0 : i32, i32, i32
  }
  func.func @transform_1(%arg0: i32) -> (i32, i32) {
    %c0_i32 = arith.constant 0 : i32
    %c0_i32_0 = arith.constant 0 : i32
    %c0_i32_1 = arith.constant 0 : i32
    return %c0_i32, %c0_i32_0 : i32, i32
  }
  func.func @transform_2(%arg0: i32) -> (i32, i32) {
    %c0_i32 = arith.constant 0 : i32
    %c0_i32_0 = arith.constant 0 : i32
    %c0_i32_1 = arith.constant 0 : i32
    return %c0_i32, %c0_i32_0 : i32, i32
  }
  func.func @transform_3(%arg0: i32) -> (i32, i32) {
    %c0_i32 = arith.constant 0 : i32
    %c0_i32_0 = arith.constant 0 : i32
    %c0_i32_1 = arith.constant 0 : i32
    return %c0_i32, %c0_i32_0 : i32, i32
  }
  func.func @transform_4(%arg0: i32) -> (i32, i32) {
    %c0_i32 = arith.constant 0 : i32
    %c0_i32_0 = arith.constant 0 : i32
    %c0_i32_1 = arith.constant 0 : i32
    return %c0_i32, %c0_i32_0 : i32, i32
  }
  func.func @transform_5(%arg0: i32) -> (i32, i32, i32) {
    %c0_i32 = arith.constant 0 : i32
    %c0_i32_0 = arith.constant 0 : i32
    %c0_i32_1 = arith.constant 0 : i32
    %c0_i32_2 = arith.constant 0 : i32
    return %c0_i32, %c0_i32_0, %c0_i32_1 : i32, i32, i32
  }
  func.func @transform_6(%arg0: i32) -> (i32, i32, i32) {
    %c0_i32 = arith.constant 0 : i32
    %c0_i32_0 = arith.constant 0 : i32
    %c0_i32_1 = arith.constant 0 : i32
    return %arg0, %c0_i32, %c0_i32_0 : i32, i32, i32
  }
}

</mosaic_0001>

<bundles_post_ra>
// kernel: resblock_forward.1
= control target key start
LH: loop header
LB: loop body
LE: loop exit
PB: predicated region body
PF: predicated region fallthrough
CT: control target
= control target key end

     0   :  { %v954_v2 = vmov 0.0   ;;  %s956_s25 = smov 16   ;;  %s957_s26 = smov 15   ;;  %v963_v5 = vmov 0   ;;  %v76_v7 = vlaneseq  ;;  %vm380_vm8 = vcmask 1043456   ;;  %s1502_s0 = inlined_call_operand.vmem [shape: f32[1,4,512], index: 0, kind: input, shape index: {}]   ;;  %s1503_s3 = inlined_call_operand.vmem [shape: f32[4,1], index: 3, kind: input, shape index: {}]   ;;  %s1504_s5 = inlined_call_operand.vmem [shape: f32[9,4,512], index: 5, kind: input, shape index: {}]   ;;  %s1505_s1 = inlined_call_operand.vmem [shape: bf16[4,72], index: 1, kind: input, shape index: {}]   ;;  %s1506_s4 = inlined_call_operand.vmem [shape: f32[4,1], index: 4, kind: input, shape index: {}]   ;;  %s1507_s2 = inlined_call_operand.vmem [shape: bf16[4,72], index: 2, kind: input, shape index: {}]   ;;  %s1508_s6 = inlined_call_operand.vmem [shape: f32[1,4,512], index: 6, kind: output, shape index: {}]  }
   0x1   :  { %v1002_v0 = vld [vmem:[%s1502_s0 + $0x8] sm:$0xff]  ;;  %v1007_v1 = vld [vmem:[%s1502_s0] sm:$0xff]  ;;  %24 = vst [vmem:[#allocation2] sm:$0xff] %v954_v2  ;;  %27 = vst [vmem:[#allocation2 + $0x18] sm:$0xff] %v954_v2  ;;  %s955_s0 = smov 17   ;;  %s958_s27 = smov 1   ;;  %425 = vmatprep.mubr.bf16.mxu0 %v963_v5  ;;  %466 = vmatprep.mubr.bf16.mxu1 %v963_v5 }
   0x2   :  { %25 = vst [vmem:[#allocation2 + $0x8] sm:$0xff] %v954_v2  ;;  %26 = vst [vmem:[#allocation2 + $0x10] sm:$0xff] %v954_v2  ;;  %72 = vrot.lane.b32.xlu1 %v1002_v0, %s955_s0  ;;  %68 = vrot.lane.b32.xlu0 %v1007_v1, %s955_s0  ;;  %v1015_v3 = vcombine.high %v1002_v0, %v1002_v0  ;;  %v1019_v4 = vcombine.high %v1007_v1, %v1007_v1  ;;  %s959_s28 = smov 127   ;;  %s960_s29 = smov 113   ;;  %v370_v6 = vld [vmem:[%s1503_s3] sm:$0xf] }
   0x3   :  { %28 = vst [vmem:[#allocation2 + $0x20] sm:$0xff] %v954_v2  ;;  %29 = vst [vmem:[#allocation2 + $0x28] sm:$0xff] %v954_v2  ;;  %s961_s30 = smov 112   ;;  %s962_s7 = smov 111   ;;  %935 = vset.pattern.permute.xlu0 %v963_v5  ;;  %v1091_v8 = vand.u32 127, %v76_v7  ;;  %v1096_v9 = vld [vmem:[%s1504_s5] sm:$0xff] }
   0x4   :  { %30 = vst [vmem:[#allocation2 + $0x30] sm:$0xff] %v954_v2  ;;  %31 = vst [vmem:[#allocation2 + $0x38] sm:$0xff] %v954_v2  ;;  %v1101_v10 = vld [vmem:[%s1504_s5 + $0x8] sm:$0xff]  ;;  %v1106_v13 = vld [vmem:[%s1504_s5 + $0x10] sm:$0xff]  ;;  %v1115_v15 = vcombine.high %v1096_v9, %v1096_v9  ;;  %vm376_vm9 = vcmask 588800  }
   0x5   :  { %32 = vst [vmem:[#allocation2 + $0x40] sm:$0xff] %v954_v2  ;;  %33 = vst [vmem:[#allocation2 + $0x48] sm:$0xff] %v954_v2  ;;  %vm78_vm0 = vcmp.lt.s32.totalorder %v1091_v8, 17  ;;  %v1111_v14 = vcombine.high %v1101_v10, %v1101_v10  ;;  %vm107_vm1 = vcmp.lt.s32.totalorder %v1091_v8, 16  ;;  %v1120_v18 = vcombine.high %v1106_v13, %v1106_v13  ;;  %v1137_v27 = vld [vmem:[%s1504_s5 + $0x18] sm:$0xff]  ;;  %v1149_v33 = vld [vmem:[%s1504_s5 + $0x20] sm:$0xff] }
   0x6   :  { %34 = vst [vmem:[#allocation2 + $0x50] sm:$0xff] %v954_v2  ;;  %35 = vst [vmem:[#allocation2 + $0x58] sm:$0xff] %v954_v2  ;;  %74 = vrot.lane.b32.xlu1 %v1015_v3, %s955_s0  ;;  %70 = vrot.lane.b32.xlu0 %v1019_v4, %s955_s0  ;;  %v1144_v32 = vcombine.high %v1137_v27, %v1137_v27  ;;  %vm137_vm2 = vcmp.lt.s32.totalorder %v1091_v8, 15  ;;  %v1163_v42 = vcombine.high %v1149_v33, %v1149_v33  ;;  %v1168_v43 = vld [vmem:[%s1504_s5 + $0x28] sm:$0xff]  ;;  %v1180_v51 = vld [vmem:[%s1504_s5 + $0x30] sm:$0xff] }
   0x7   :  { %36 = vst [vmem:[#allocation2 + $0x60] sm:$0xff] %v954_v2  ;;  %37 = vst [vmem:[#allocation2 + $0x68] sm:$0xff] %v954_v2  ;;  %v1175_v48 = vcombine.high %v1168_v43, %v1168_v43  ;;  %vm167_vm3 = vcmp.lt.s32.totalorder %v1091_v8, 1  ;;  %v1192_v58 = vld [vmem:[%s1504_s5 + $0x38] sm:$0xff]  ;;  %v1199_v62 = vcombine.high %v1180_v51, %v1180_v51  ;;  %vm201_vm4 = vcmp.lt.s32.totalorder %v1091_v8, 127 }
   0x8   :  { %38 = vst [vmem:[#allocation2 + $0x70] sm:$0xff] %v954_v2  ;;  %39 = vst [vmem:[#allocation2 + $0x78] sm:$0xff] %v954_v2  ;;  %vm231_vm5 = vcmp.lt.s32.totalorder %v1091_v8, 113  ;;  %vm261_vm6 = vcmp.lt.s32.totalorder %v1091_v8, 112  ;;  %vm291_vm7 = vcmp.lt.s32.totalorder %v1091_v8, 111 }
   0x9   :  { %40 = vst [vmem:[#allocation2 + $0x80] sm:$0xff] %v954_v2  ;;  %41 = vst [vmem:[#allocation2 + $0x88] sm:$0xff] %v954_v2 }
   0xa   :  { %42 = vst [vmem:[#allocation2 + $0x90] sm:$0xff] %v954_v2  ;;  %43 = vst [vmem:[#allocation2 + $0x98] sm:$0xff] %v954_v2  ;;  %101 = vrot.lane.b32.xlu1 %v1019_v4, %s956_s25  ;;  %99 = vrot.lane.b32.xlu0 %v1007_v1, %s956_s25 }
   0xb   :  { %44 = vst [vmem:[#allocation2 + $0xa0] sm:$0xff] %v954_v2  ;;  %45 = vst [vmem:[#allocation2 + $0xa8] sm:$0xff] %v954_v2 }
   0xc   :  { %46 = vst [vmem:[#allocation2 + $0xb0] sm:$0xff] %v954_v2  ;;  %47 = vst [vmem:[#allocation2 + $0xb8] sm:$0xff] %v954_v2 }
   0xd   :  { %48 = vst [vmem:[#allocation2 + $0xc0] sm:$0xff] %v954_v2  ;;  %49 = vst [vmem:[#allocation2 + $0xc8] sm:$0xff] %v954_v2 }
   0xe   :  { %50 = vst [vmem:[#allocation2 + $0xd0] sm:$0xff] %v954_v2  ;;  %51 = vst [vmem:[#allocation2 + $0xd8] sm:$0xff] %v954_v2  ;;  %105 = vrot.lane.b32.xlu1 %v1015_v3, %s956_s25  ;;  %103 = vrot.lane.b32.xlu0 %v1002_v0, %s956_s25 }
   0xf   :  { %52 = vst [vmem:[#allocation2 + $0xe0] sm:$0xff] %v954_v2  ;;  %53 = vst [vmem:[#allocation2 + $0xe8] sm:$0xff] %v954_v2 }
  0x10   :  { %54 = vst [vmem:[#allocation2 + $0xf0] sm:$0xff] %v954_v2  ;;  %55 = vst [vmem:[#allocation2 + $0xf8] sm:$0xff] %v954_v2 }
  0x11   :  { %56 = vst [vmem:[#allocation2 + $0x100] sm:$0xff] %v954_v2  ;;  %57 = vst [vmem:[#allocation2 + $0x108] sm:$0xff] %v954_v2 }
  0x12   :  { %58 = vst [vmem:[#allocation2 + $0x110] sm:$0xff] %v954_v2  ;;  %59 = vst [vmem:[#allocation2 + $0x118] sm:$0xff] %v954_v2  ;;  %131 = vrot.lane.b32.xlu1 %v1019_v4, %s957_s26  ;;  %129 = vrot.lane.b32.xlu0 %v1007_v1, %s957_s26 }
  0x13   :  { %189 = vst [vmem:[#allocation2 + $0x80] sm:$0xf] %v1007_v1  ;;  %191 = vst [vmem:[#allocation2 + $0x90] sm:$0xf] %v1002_v0 }
  0x14   :  { %190 = vst [vmem:[#allocation2 + $0x88] sm:$0xf] %v1019_v4  ;;  %192 = vst [vmem:[#allocation2 + $0x98] sm:$0xf] %v1015_v3 }
  0x16   :  { %135 = vrot.lane.b32.xlu1 %v1015_v3, %s957_s26  ;;  %133 = vrot.lane.b32.xlu0 %v1002_v0, %s957_s26 }
  0x1a   :  { %161 = vrot.lane.b32.xlu1 %v1019_v4, %s958_s27  ;;  %159 = vrot.lane.b32.xlu0 %v1007_v1, %s958_s27 }
  0x1e   :  { %165 = vrot.lane.b32.xlu1 %v1015_v3, %s958_s27  ;;  %163 = vrot.lane.b32.xlu0 %v1002_v0, %s958_s27 }
  0x22   :  { %195 = vrot.lane.b32.xlu1 %v1019_v4, %s959_s28  ;;  %193 = vrot.lane.b32.xlu0 %v1007_v1, %s959_s28 }
  0x26   :  { %199 = vrot.lane.b32.xlu1 %v1015_v3, %s959_s28  ;;  %197 = vrot.lane.b32.xlu0 %v1002_v0, %s959_s28 }
  0x2a   :  { %225 = vrot.lane.b32.xlu1 %v1019_v4, %s960_s29  ;;  %223 = vrot.lane.b32.xlu0 %v1007_v1, %s960_s29 }
  0x2e   :  { %229 = vrot.lane.b32.xlu1 %v1015_v3, %s960_s29  ;;  %227 = vrot.lane.b32.xlu0 %v1002_v0, %s960_s29 }
  0x32   :  { %255 = vrot.lane.b32.xlu1 %v1019_v4, %s961_s30  ;;  %253 = vrot.lane.b32.xlu0 %v1007_v1, %s961_s30 }
  0x36   :  { %259 = vrot.lane.b32.xlu1 %v1015_v3, %s961_s30  ;;  %257 = vrot.lane.b32.xlu0 %v1002_v0, %s961_s30 }
  0x3a   :  { %285 = vrot.lane.b32.xlu1 %v1019_v4, %s962_s7  ;;  %283 = vrot.lane.b32.xlu0 %v1007_v1, %s962_s7 }
  0x3e   :  { %289 = vrot.lane.b32.xlu1 %v1015_v3, %s962_s7  ;;  %287 = vrot.lane.b32.xlu0 %v1002_v0, %s962_s7 }
  0x42   :  { %373 = vperm.xlu0 %935, %v370_v6  }
  0x74   :  { %v73_v11 = vpop.permute.xlu1 %72  ;;  %v69_v12 = vpop.permute.xlu0 %68 }
  0x78   :  { %v75_v16 = vpop.permute.xlu1 %74  ;;  %v71_v17 = vpop.permute.xlu0 %70 }
  0x79   :  { %v79_v19 = vsel %vm78_vm0, %v73_v11, %v75_v16  ;;  %v82_v20 = vsel %vm78_vm0, %v75_v16, %v69_v12  ;;  %v80_v21 = vsel %vm78_vm0, %v71_v17, %v73_v11  ;;  %v81_v22 = vsel %vm78_vm0, %v69_v12, %v71_v17 }
  0x7a   :  { %v91_v23 = vmul.f32 %v1096_v9, %v82_v20  ;;  %v94_v24 = vmul.f32 %v1111_v14, %v79_v19  ;;  %v92_v25 = vmul.f32 %v1115_v15, %v81_v22  ;;  %v93_v26 = vmul.f32 %v1101_v10, %v80_v21 }
  0x7c   :  { %95 = vst [vmem:[#allocation2] sm:$0xf] %v91_v23  ;;  %98 = vst [vmem:[#allocation2 + $0x18] sm:$0xf] %v94_v24  ;;  %v102_v28 = vpop.permute.xlu1 %101  ;;  %v100_v29 = vpop.permute.xlu0 %99  ;;  %v1206_v24 = vcombine.high %v1192_v58, %v1192_v58 }
  0x7d   :  { %96 = vst [vmem:[#allocation2 + $0x8] sm:$0xf] %v92_v25  ;;  %97 = vst [vmem:[#allocation2 + $0x10] sm:$0xf] %v93_v26  ;;  %v110_v30 = vsel %vm107_vm1, %v100_v29, %v102_v28 }
  0x7e   :  { %v122_v31 = vmul.f32 %v1120_v18, %v110_v30 }
  0x80   :  { %126 = vst [vmem:[#allocation2 + $0x28] sm:$0xf] %v122_v31  ;;  %v106_v34 = vpop.permute.xlu1 %105  ;;  %v104_v35 = vpop.permute.xlu0 %103 }
  0x81   :  { %v111_v36 = vsel %vm107_vm1, %v106_v34, %v100_v29  ;;  %v108_v37 = vsel %vm107_vm1, %v104_v35, %v106_v34  ;;  %v109_v38 = vsel %vm107_vm1, %v102_v28, %v104_v35 }
  0x82   :  { %v121_v39 = vmul.f32 %v1106_v13, %v111_v36  ;;  %v123_v40 = vmul.f32 %v1137_v27, %v109_v38  ;;  %v124_v41 = vmul.f32 %v1144_v32, %v108_v37  ;;  %v1221_v36 = vld [vmem:[%s1504_s5 + $0x50] sm:$0xff]  ;;  %v1226_v37 = vld [vmem:[%s1504_s5 + $0x58] sm:$0xff] }
  0x83   :  { %v314_v63 = vld [vmem:[#allocation2] sm:$0xff]  ;;  %v317_v2 = vld [vmem:[#allocation2 + $0x18] sm:$0xff] }
  0x84   :  { %125 = vst [vmem:[#allocation2 + $0x20] sm:$0xf] %v121_v39  ;;  %127 = vst [vmem:[#allocation2 + $0x30] sm:$0xf] %v123_v40  ;;  %v132_v44 = vpop.permute.xlu1 %131  ;;  %v130_v45 = vpop.permute.xlu0 %129  ;;  %v315_v49 = vld [vmem:[#allocation2 + $0x8] sm:$0xff]  ;;  %v316_v6 = vld [vmem:[#allocation2 + $0x10] sm:$0xff] }
  0x85   :  { %128 = vst [vmem:[#allocation2 + $0x38] sm:$0xf] %v124_v41  ;;  %v140_v46 = vsel %vm137_vm2, %v130_v45, %v132_v44 }
  0x86   :  { %v152_v47 = vmul.f32 %v1163_v42, %v140_v46 }
  0x87   :  { %v319_v50 = vld [vmem:[#allocation2 + $0x28] sm:$0xff] }
  0x88   :  { %156 = vst [vmem:[#allocation2 + $0x48] sm:$0xf] %v152_v47  ;;  %v136_v52 = vpop.permute.xlu1 %135  ;;  %v134_v53 = vpop.permute.xlu0 %133  ;;  %v351_v54 = vpack.c.bf16 %v319_v50, %v315_v49 }
  0x89   :  { %v141_v55 = vsel %vm137_vm2, %v136_v52, %v130_v45  ;;  %v138_v56 = vsel %vm137_vm2, %v134_v53, %v136_v52  ;;  %v139_v57 = vsel %vm137_vm2, %v132_v44, %v134_v53  ;;  %v1233_v44 = vcombine.high %v1226_v37, %v1226_v37 }
  0x8a   :  { %v151_v59 = vmul.f32 %v1149_v33, %v141_v55  ;;  %v153_v60 = vmul.f32 %v1168_v43, %v139_v57  ;;  %v154_v61 = vmul.f32 %v1175_v48, %v138_v56  ;;  %393 = vmatprep.subr.bf16.mxu0 %v351_v54  ;;  %v1237_v45 = vcombine.high %v1221_v36, %v1221_v36  ;;  %v1248_v56 = vld [vmem:[%s1504_s5 + $0x60] sm:$0xff]  ;;  %v1253_v57 = vld [vmem:[%s1504_s5 + $0x68] sm:$0xff] }
  0x8b   :  { %v318_v7 = vld [vmem:[#allocation2 + $0x20] sm:$0xff]  ;;  %v320_v12 = vld [vmem:[#allocation2 + $0x30] sm:$0xff] }
  0x8c   :  { %v321_v11 = vld [vmem:[#allocation2 + $0x38] sm:$0xff]  ;;  %155 = vst [vmem:[#allocation2 + $0x40] sm:$0xf] %v151_v59  ;;  %157 = vst [vmem:[#allocation2 + $0x50] sm:$0xf] %v153_v60  ;;  %v162_v16 = vpop.permute.xlu1 %161  ;;  %v160_v17 = vpop.permute.xlu0 %159  ;;  %v350_v19 = vpack.c.bf16 %v318_v7, %v314_v63  ;;  %v352_v21 = vpack.c.bf16 %v320_v12, %v316_v6 }
  0x8d   :  { %158 = vst [vmem:[#allocation2 + $0x58] sm:$0xf] %v154_v61  ;;  %v353_v20 = vpack.c.bf16 %v321_v11, %v317_v2  ;;  %v170_v22 = vsel %vm167_vm3, %v160_v17, %v162_v16 }
  0x8e   :  { %v182_v23 = vmul.f32 %v1199_v62, %v170_v22  ;;  %394 = vmatpush1.bf16.msra.mxu0 %v350_v19 }
  0x8f   :  { %434 = vmatprep.subr.bf16.mxu1 %v353_v20  ;;  %v323_v46 = vld [vmem:[#allocation2 + $0x48] sm:$0xff] }
  0x90   :  { %435 = vmatpush1.bf16.msra.mxu1 %v352_v21  ;;  %186 = vst [vmem:[#allocation2 + $0x68] sm:$0xf] %v182_v23  ;;  %v166_v25 = vpop.permute.xlu1 %165  ;;  %v164_v26 = vpop.permute.xlu0 %163 }
  0x91   :  { %v171_v28 = vsel %vm167_vm3, %v166_v25, %v160_v17  ;;  %v168_v29 = vsel %vm167_vm3, %v164_v26, %v166_v25  ;;  %v169_v30 = vsel %vm167_vm3, %v162_v16, %v164_v26  ;;  %v1264_v25 = vcombine.high %v1253_v57, %v1253_v57 }
  0x92   :  { %v181_v31 = vmul.f32 %v1180_v51, %v171_v28  ;;  %v183_v34 = vmul.f32 %v1192_v58, %v169_v30  ;;  %v184_v35 = vmul.f32 %v1206_v24, %v168_v29  ;;  %v1268_v26 = vcombine.high %v1248_v56, %v1248_v56  ;;  %v330_v30 = vld [vmem:[#allocation2 + $0x80] sm:$0xff] }
  0x93   :  { %v322_v63 = vld [vmem:[#allocation2 + $0x40] sm:$0xff]  ;;  %v324_v6 = vld [vmem:[#allocation2 + $0x50] sm:$0xff] }
  0x94   :  { %185 = vst [vmem:[#allocation2 + $0x60] sm:$0xf] %v181_v31  ;;  %187 = vst [vmem:[#allocation2 + $0x70] sm:$0xf] %v183_v34  ;;  %v196_v38 = vpop.permute.xlu1 %195  ;;  %v194_v39 = vpop.permute.xlu0 %193  ;;  %v325_v2 = vld [vmem:[#allocation2 + $0x58] sm:$0xff] }
  0x95   :  { %188 = vst [vmem:[#allocation2 + $0x78] sm:$0xf] %v184_v35  ;;  %v204_v40 = vsel %vm201_vm4, %v194_v39, %v196_v38 }
  0x96   :  { %v215_v41 = vmul.f32 %v1221_v36, %v204_v40  ;;  %v332_v40 = vld [vmem:[#allocation2 + $0x90] sm:$0xff] }
  0x97   :  { %v327_v47 = vld [vmem:[#allocation2 + $0x68] sm:$0xff] }
  0x98   :  { %219 = vst [vmem:[#allocation2 + $0xa0] sm:$0xf] %v215_v41  ;;  %v200_v49 = vpop.permute.xlu1 %199  ;;  %v198_v50 = vpop.permute.xlu0 %197  ;;  %v355_v52 = vpack.c.bf16 %v327_v47, %v323_v46 }
  0x99   :  { %v205_v53 = vsel %vm201_vm4, %v200_v49, %v194_v39  ;;  %v202_v54 = vsel %vm201_vm4, %v198_v50, %v200_v49  ;;  %v203_v55 = vsel %vm201_vm4, %v196_v38, %v198_v50  ;;  %v331_v38 = vld [vmem:[#allocation2 + $0x88] sm:$0xff]  ;;  %v333_v39 = vld [vmem:[#allocation2 + $0x98] sm:$0xff]  ;;  %v1283_v49 = vld [vmem:[%s1504_s5 + $0x70] sm:$0xff] }
  0x9a   :  { %v218_v59 = vmul.f32 %v1233_v44, %v205_v53  ;;  %v216_v60 = vmul.f32 %v1237_v45, %v203_v55  ;;  %v217_v61 = vmul.f32 %v1226_v37, %v202_v54  ;;  %395 = vmatprep.subr.bf16.mxu0 %v355_v52  ;;  %v1288_v52 = vld [vmem:[%s1504_s5 + $0x78] sm:$0xff] }
  0x9b   :  { %v326_v7 = vld [vmem:[#allocation2 + $0x60] sm:$0xff]  ;;  %v328_v12 = vld [vmem:[#allocation2 + $0x70] sm:$0xff] }
  0x9c   :  { %v329_v11 = vld [vmem:[#allocation2 + $0x78] sm:$0xff]  ;;  %222 = vst [vmem:[#allocation2 + $0xb8] sm:$0xf] %v218_v59  ;;  %220 = vst [vmem:[#allocation2 + $0xa8] sm:$0xf] %v216_v60  ;;  %v226_v16 = vpop.permute.xlu1 %225  ;;  %v224_v17 = vpop.permute.xlu0 %223  ;;  %v354_v19 = vpack.c.bf16 %v326_v7, %v322_v63  ;;  %v356_v21 = vpack.c.bf16 %v328_v12, %v324_v6  ;;  %v1295_v12 = vcombine.high %v1288_v52, %v1288_v52 }
  0x9d   :  { %221 = vst [vmem:[#allocation2 + $0xb0] sm:$0xf] %v217_v61  ;;  %v357_v20 = vpack.c.bf16 %v329_v11, %v325_v2  ;;  %v234_v22 = vsel %vm231_vm5, %v224_v17, %v226_v16 }
  0x9e   :  { %v245_v23 = vmul.f32 %v1248_v56, %v234_v22  ;;  %396 = vmatpush1.bf16.msra.mxu0 %v354_v19 }
  0x9f   :  { %436 = vmatprep.subr.bf16.mxu1 %v357_v20  ;;  %v334_v50 = vld [vmem:[#allocation2 + $0xa0] sm:$0xff] }
  0xa0   :  { %437 = vmatpush1.bf16.msra.mxu1 %v356_v21  ;;  %249 = vst [vmem:[#allocation2 + $0xc0] sm:$0xf] %v245_v23  ;;  %v230_v28 = vpop.permute.xlu1 %229  ;;  %v228_v29 = vpop.permute.xlu0 %227  ;;  %v358_v7 = vpack.c.bf16 %v334_v50, %v330_v30  ;;  %v1314_v30 = vld [vmem:[%s1504_s5 + $0x80] sm:$0xff] }
  0xa1   :  { %v235_v31 = vsel %vm231_vm5, %v230_v28, %v224_v17  ;;  %v232_v34 = vsel %vm231_vm5, %v228_v29, %v230_v28  ;;  %v233_v35 = vsel %vm231_vm5, %v226_v16, %v228_v29  ;;  %v1299_v16 = vcombine.high %v1283_v49, %v1283_v49 }
  0xa2   :  { %v248_v41 = vmul.f32 %v1264_v25, %v235_v31  ;;  %v246_v46 = vmul.f32 %v1268_v26, %v233_v35  ;;  %v247_v47 = vmul.f32 %v1253_v57, %v232_v34  ;;  %v1319_v31 = vld [vmem:[%s1504_s5 + $0x88] sm:$0xff] }
  0xa3   :  { %v335_v53 = vld [vmem:[#allocation2 + $0xa8] sm:$0xff]  ;;  %v337_v54 = vld [vmem:[#allocation2 + $0xb8] sm:$0xff] }
  0xa4   :  { %v336_v55 = vld [vmem:[#allocation2 + $0xb0] sm:$0xff]  ;;  %252 = vst [vmem:[#allocation2 + $0xd8] sm:$0xf] %v248_v41  ;;  %250 = vst [vmem:[#allocation2 + $0xc8] sm:$0xf] %v246_v46  ;;  %v256_v59 = vpop.permute.xlu1 %255  ;;  %v254_v60 = vpop.permute.xlu0 %253  ;;  %v359_v61 = vpack.c.bf16 %v335_v53, %v331_v38  ;;  %v361_v63 = vpack.c.bf16 %v337_v54, %v333_v39  ;;  %v1330_v41 = vcombine.high %v1314_v30, %v1314_v30 }
  0xa5   :  { %251 = vst [vmem:[#allocation2 + $0xd0] sm:$0xf] %v247_v47  ;;  %v360_v2 = vpack.c.bf16 %v336_v55, %v332_v40  ;;  %v264_v6 = vsel %vm261_vm6, %v254_v60, %v256_v59  ;;  %v1326_v40 = vcombine.high %v1319_v31, %v1319_v31 }
  0xa6   :  { %v275_v11 = vmul.f32 %v1283_v49, %v264_v6  ;;  %397 = vmatprep.subr.bf16.mxu0 %v359_v61  ;;  %438 = vmatprep.subr.bf16.mxu1 %v361_v63 }
  0xa7   :  { %398 = vmatpush1.bf16.msra.mxu0 %v358_v7  ;;  %439 = vmatpush1.bf16.msra.mxu1 %v360_v2 }
  0xa8   :  { %279 = vst [vmem:[#allocation2 + $0xe0] sm:$0xf] %v275_v11  ;;  %v260_v17 = vpop.permute.xlu1 %259  ;;  %v258_v19 = vpop.permute.xlu0 %257 }
  0xa9   :  { %v265_v20 = vsel %vm261_vm6, %v260_v17, %v254_v60  ;;  %v262_v21 = vsel %vm261_vm6, %v258_v19, %v260_v17  ;;  %v263_v22 = vsel %vm261_vm6, %v256_v59, %v258_v19 }
  0xaa   :  { %v278_v23 = vmul.f32 %v1295_v12, %v265_v20  ;;  %v276_v28 = vmul.f32 %v1299_v16, %v263_v22  ;;  %v277_v29 = vmul.f32 %v1288_v52, %v262_v21  ;;  %v338_v21 = vld [vmem:[#allocation2 + $0xc0] sm:$0xff] }
  0xab   :  { %v339_v55 = vld [vmem:[#allocation2 + $0xc8] sm:$0xff]  ;;  %v341_v63 = vld [vmem:[#allocation2 + $0xd8] sm:$0xff] }
  0xac   :  { %282 = vst [vmem:[#allocation2 + $0xf8] sm:$0xf] %v278_v23  ;;  %280 = vst [vmem:[#allocation2 + $0xe8] sm:$0xf] %v276_v28  ;;  %v286_v34 = vpop.permute.xlu1 %285  ;;  %v284_v35 = vpop.permute.xlu0 %283  ;;  %v340_v6 = vld [vmem:[#allocation2 + $0xd0] sm:$0xff] }
  0xad   :  { %281 = vst [vmem:[#allocation2 + $0xf0] sm:$0xf] %v277_v29  ;;  %v294_v38 = vsel %vm291_vm7, %v284_v35, %v286_v34 }
  0xae   :  { %v305_v39 = vmul.f32 %v1314_v30, %v294_v38 }
  0xaf   :  { %v342_v2 = vld [vmem:[#allocation2 + $0xe0] sm:$0xff] }
  0xb0   :  { %309 = vst [vmem:[#allocation2 + $0x100] sm:$0xf] %v305_v39  ;;  %v290_v46 = vpop.permute.xlu1 %289  ;;  %v288_v47 = vpop.permute.xlu0 %287  ;;  %v362_v23 = vpack.c.bf16 %v342_v2, %v338_v21 }
  0xb1   :  { %v295_v50 = vsel %vm291_vm7, %v290_v46, %v284_v35  ;;  %v292_v53 = vsel %vm291_vm7, %v288_v47, %v290_v46  ;;  %v293_v54 = vsel %vm291_vm7, %v286_v34, %v288_v47 }
  0xb2   :  { %v308_v59 = vmul.f32 %v1326_v40, %v295_v50  ;;  %v306_v60 = vmul.f32 %v1330_v41, %v293_v54  ;;  %v307_v61 = vmul.f32 %v1319_v31, %v292_v53  ;;  %v313_v54 = vld [vmem:[%s1505_s1] sm:$0x3] }
  0xb3   :  { %v343_v7 = vld [vmem:[#allocation2 + $0xe8] sm:$0xff]  ;;  %v345_v11 = vld [vmem:[#allocation2 + $0xf8] sm:$0xff] }
  0xb4   :  { %v344_v17 = vld [vmem:[#allocation2 + $0xf0] sm:$0xff]  ;;  %312 = vst [vmem:[#allocation2 + $0x118] sm:$0xf] %v308_v59  ;;  %310 = vst [vmem:[#allocation2 + $0x108] sm:$0xf] %v306_v60  ;;  %v363_v19 = vpack.c.bf16 %v343_v7, %v339_v55  ;;  %v365_v20 = vpack.c.bf16 %v345_v11, %v341_v63 }
  0xb5   :  { %311 = vst [vmem:[#allocation2 + $0x110] sm:$0xf] %v307_v61  ;;  %v364_v22 = vpack.c.bf16 %v344_v17, %v340_v6 }
  0xb6   :  { %399 = vmatprep.subr.bf16.mxu0 %v363_v19  ;;  %440 = vmatprep.subr.bf16.mxu1 %v365_v20 }
  0xb7   :  { %400 = vmatpush1.bf16.msra.mxu0 %v362_v23  ;;  %441 = vmatpush1.bf16.msra.mxu1 %v364_v22  ;;  %v346_v28 = vld [vmem:[#allocation2 + $0x100] sm:$0xff] }
  0xb8   :  { %v366_v29 = vpack.c.bf16 %v346_v28, %v346_v28 }
  0xba   :  { %v382_v50 = vsel %vm380_vm8, %v366_v29, 0 }
  0xbb   :  { %v347_v34 = vld [vmem:[#allocation2 + $0x108] sm:$0xff]  ;;  %v349_v35 = vld [vmem:[#allocation2 + $0x118] sm:$0xff] }
  0xbc   :  { %v348_v38 = vld [vmem:[#allocation2 + $0x110] sm:$0xff]  ;;  %v367_v39 = vpack.c.bf16 %v347_v34, %v347_v34  ;;  %v369_v46 = vpack.c.bf16 %v349_v35, %v349_v35 }
  0xbd   :  { %v368_v47 = vpack.c.bf16 %v348_v38, %v348_v38 }
  0xbe   :  { %903 = vmatprep.subr.msk.bf16.mxu0 %vm380_vm8, %v367_v39  ;;  %905 = vmatprep.subr.msk.bf16.mxu1 %vm380_vm8, %v369_v46 }
  0xbf   :  { %v388_v53 = vsel %vm380_vm8, %v368_v47, 0  ;;  %402 = vmatpush1.bf16.msra.mxu0 %v382_v50 }
  0xc0   :  { %443 = vmatpush1.bf16.msra.mxu1 %v388_v53 }
  0xc1   :  { %v374_v55 = vpop.permute.xlu0 %373 }
  0xc2   :  { %904 = vmatmul.mubr.msk.bf16.vlgmr.msra.gmra.mrb[0].mxu0 %vm376_vm9, %v313_v54 }
  0xc3   :  { %906 = vmatmul.mubr.msk.bf16.vlgmr.msra.gmra.mrb[0].mxu1 %vm376_vm9, %v313_v54  ;;  %817 = vmatprep.mubr.bf16.mxu0 %v963_v5 }
  0xc4   :  { %858 = vmatprep.mubr.bf16.mxu1 %v963_v5  ;;  %v764_v5 = vld [vmem:[%s1506_s4] sm:$0xf] }
 0x195   :  { %v427_v60 = vpop.f32.mrb[0].mxu0 }
 0x196   :  { %v468_v59 = vpop.f32.mrb[0].mxu1  ;;  %v428_v63 = vadd.f32 %v427_v60, %v374_v55  ;;  %v429_v2 = vpop.f32.mrb[1].mxu0 }
 0x197   :  { %v469_v61 = vadd.f32 %v468_v59, %v374_v55  ;;  %v470_v6 = vpop.f32.mrb[1].mxu1  ;;  %v430_v7 = vadd.f32 %v429_v2, %v374_v55  ;;  %v431_v17 = vpop.f32.mrb[2].mxu0 }
 0x198   :  { %v471_v11 = vadd.f32 %v470_v6, %v374_v55  ;;  %v472_v19 = vpop.f32.mrb[2].mxu1  ;;  %v475_v21 = vmax.f32 %v428_v63, 0.0  ;;  %v432_v22 = vpop.f32.mrb[3].mxu0 }
 0x199   :  { %v477_v20 = vmax.f32 %v469_v61, 0.0  ;;  %v473_v23 = vpop.f32.mrb[3].mxu1  ;;  %v476_v28 = vmax.f32 %v430_v7, 0.0 }
 0x19a   :  { %v478_v29 = vmax.f32 %v471_v11, 0.0  ;;  %591 = vst [vmem:[#allocation2 + $0x80] sm:$0xf] %v475_v21  ;;  %479 = vrot.lane.b32.xlu1 %v475_v21, %s955_s0 }
 0x19b   :  { %593 = vst [vmem:[#allocation2 + $0x90] sm:$0xf] %v477_v20  ;;  %483 = vrot.lane.b32.xlu0 %v477_v20, %s955_s0  ;;  %592 = vst [vmem:[#allocation2 + $0x88] sm:$0xf] %v476_v28 }
 0x19c   :  { %594 = vst [vmem:[#allocation2 + $0x98] sm:$0xf] %v478_v29 }
 0x19e   :  { %481 = vrot.lane.b32.xlu1 %v476_v28, %s955_s0 }
 0x19f   :  { %507 = vrot.lane.b32.xlu0 %v475_v21, %s956_s25 }
 0x1a2   :  { %485 = vrot.lane.b32.xlu1 %v478_v29, %s955_s0 }
 0x1a3   :  { %511 = vrot.lane.b32.xlu0 %v477_v20, %s956_s25 }
 0x1a6   :  { %509 = vrot.lane.b32.xlu1 %v476_v28, %s956_s25 }
 0x1a7   :  { %535 = vrot.lane.b32.xlu0 %v475_v21, %s957_s26 }
 0x1aa   :  { %513 = vrot.lane.b32.xlu1 %v478_v29, %s956_s25 }
 0x1ab   :  { %539 = vrot.lane.b32.xlu0 %v477_v20, %s957_s26 }
 0x1ae   :  { %537 = vrot.lane.b32.xlu1 %v476_v28, %s957_s26 }
 0x1af   :  { %563 = vrot.lane.b32.xlu0 %v475_v21, %s958_s27 }
 0x1b2   :  { %541 = vrot.lane.b32.xlu1 %v478_v29, %s957_s26 }
 0x1b3   :  { %567 = vrot.lane.b32.xlu0 %v477_v20, %s958_s27 }
 0x1b6   :  { %565 = vrot.lane.b32.xlu1 %v476_v28, %s958_s27 }
 0x1b7   :  { %595 = vrot.lane.b32.xlu0 %v475_v21, %s959_s28 }
 0x1ba   :  { %569 = vrot.lane.b32.xlu1 %v478_v29, %s958_s27 }
 0x1bb   :  { %599 = vrot.lane.b32.xlu0 %v477_v20, %s959_s28 }
 0x1be   :  { %597 = vrot.lane.b32.xlu1 %v476_v28, %s959_s28 }
 0x1bf   :  { %623 = vrot.lane.b32.xlu0 %v475_v21, %s960_s29 }
 0x1c2   :  { %601 = vrot.lane.b32.xlu1 %v478_v29, %s959_s28 }
 0x1c3   :  { %627 = vrot.lane.b32.xlu0 %v477_v20, %s960_s29 }
 0x1c6   :  { %625 = vrot.lane.b32.xlu1 %v476_v28, %s960_s29 }
 0x1c7   :  { %651 = vrot.lane.b32.xlu0 %v475_v21, %s961_s30 }
 0x1ca   :  { %629 = vrot.lane.b32.xlu1 %v478_v29, %s960_s29 }
 0x1cb   :  { %655 = vrot.lane.b32.xlu0 %v477_v20, %s961_s30 }
 0x1ce   :  { %653 = vrot.lane.b32.xlu1 %v476_v28, %s961_s30 }
 0x1cf   :  { %679 = vrot.lane.b32.xlu0 %v475_v21, %s962_s7 }
 0x1d2   :  { %657 = vrot.lane.b32.xlu1 %v478_v29, %s961_s30 }
 0x1d3   :  { %683 = vrot.lane.b32.xlu0 %v477_v20, %s962_s7 }
 0x1d6   :  { %681 = vrot.lane.b32.xlu1 %v476_v28, %s962_s7 }
 0x1d7   :  { %767 = vperm.xlu0 %935, %v764_v5  }
 0x1da   :  { %685 = vrot.lane.b32.xlu1 %v478_v29, %s962_s7 }
 0x20c   :  { %v480_v35 = vpop.permute.xlu1 %479 }
 0x20d   :  { %v484_v34 = vpop.permute.xlu0 %483 }
 0x210   :  { %v482_v39 = vpop.permute.xlu1 %481 }
 0x211   :  { %v508_v38 = vpop.permute.xlu0 %507  ;;  %v488_v46 = vsel %vm78_vm0, %v482_v39, %v484_v34  ;;  %v489_v47 = vsel %vm78_vm0, %v480_v35, %v482_v39 }
 0x212   :  { %v500_v50 = vmul.f32 %v489_v47, %v1115_v15  ;;  %v501_v53 = vmul.f32 %v488_v46, %v1101_v10 }
 0x214   :  { %504 = vst [vmem:[#allocation2 + $0x8] sm:$0xf] %v500_v50  ;;  %505 = vst [vmem:[#allocation2 + $0x10] sm:$0xf] %v501_v53  ;;  %v486_v55 = vpop.permute.xlu1 %485 }
 0x215   :  { %v512_v54 = vpop.permute.xlu0 %511  ;;  %v487_v59 = vsel %vm78_vm0, %v484_v34, %v486_v55  ;;  %v490_v60 = vsel %vm78_vm0, %v486_v55, %v480_v35 }
 0x216   :  { %v499_v61 = vmul.f32 %v490_v60, %v1096_v9  ;;  %v502_v63 = vmul.f32 %v487_v59, %v1111_v14 }
 0x218   :  { %503 = vst [vmem:[#allocation2] sm:$0xf] %v499_v61  ;;  %506 = vst [vmem:[#allocation2 + $0x18] sm:$0xf] %v502_v63  ;;  %v510_v15 = vpop.permute.xlu1 %509 }
 0x219   :  { %v536_v2 = vpop.permute.xlu0 %535  ;;  %v516_v10 = vsel %vm107_vm1, %v510_v15, %v512_v54  ;;  %v517_v6 = vsel %vm107_vm1, %v508_v38, %v510_v15 }
 0x21a   :  { %v528_v7 = vmul.f32 %v517_v6, %v1120_v18  ;;  %v529_v11 = vmul.f32 %v1137_v27, %v516_v10 }
 0x21b   :  { %v709_v5 = vld [vmem:[#allocation2 + $0x8] sm:$0xff]  ;;  %v710_v63 = vld [vmem:[#allocation2 + $0x10] sm:$0xff] }
 0x21c   :  { %532 = vst [vmem:[#allocation2 + $0x28] sm:$0xf] %v528_v7  ;;  %533 = vst [vmem:[#allocation2 + $0x30] sm:$0xf] %v529_v11  ;;  %v514_v9 = vpop.permute.xlu1 %513 }
 0x21d   :  { %v540_v17 = vpop.permute.xlu0 %539  ;;  %v515_v14 = vsel %vm107_vm1, %v512_v54, %v514_v9  ;;  %v518_v19 = vsel %vm107_vm1, %v514_v9, %v508_v38 }
 0x21e   :  { %v527_v20 = vmul.f32 %v1106_v13, %v518_v19  ;;  %v530_v21 = vmul.f32 %v515_v14, %v1144_v32 }
 0x21f   :  { %v711_v53 = vld [vmem:[#allocation2 + $0x18] sm:$0xff] }
 0x220   :  { %531 = vst [vmem:[#allocation2 + $0x20] sm:$0xf] %v527_v20  ;;  %534 = vst [vmem:[#allocation2 + $0x38] sm:$0xf] %v530_v21  ;;  %v538_v18 = vpop.permute.xlu1 %537 }
 0x221   :  { %v564_v22 = vpop.permute.xlu0 %563  ;;  %v544_v27 = vsel %vm137_vm2, %v538_v18, %v540_v17  ;;  %v545_v23 = vsel %vm137_vm2, %v536_v2, %v538_v18 }
 0x222   :  { %v556_v28 = vmul.f32 %v545_v23, %v1163_v42  ;;  %v557_v29 = vmul.f32 %v1168_v43, %v544_v27  ;;  %v708_v42 = vld [vmem:[#allocation2] sm:$0xff] }
 0x223   :  { %v713_v34 = vld [vmem:[#allocation2 + $0x28] sm:$0xff]  ;;  %v714_v43 = vld [vmem:[#allocation2 + $0x30] sm:$0xff] }
 0x224   :  { %560 = vst [vmem:[#allocation2 + $0x48] sm:$0xf] %v556_v28  ;;  %561 = vst [vmem:[#allocation2 + $0x50] sm:$0xf] %v557_v29  ;;  %v542_v32 = vpop.permute.xlu1 %541  ;;  %v745_v35 = vpack.c.bf16 %v713_v34, %v709_v5 }
 0x225   :  { %v568_v13 = vpop.permute.xlu0 %567  ;;  %v543_v38 = vsel %vm137_vm2, %v540_v17, %v542_v32  ;;  %v546_v39 = vsel %vm137_vm2, %v542_v32, %v536_v2 }
 0x226   :  { %v555_v46 = vmul.f32 %v1149_v33, %v546_v39  ;;  %v558_v47 = vmul.f32 %v543_v38, %v1175_v48  ;;  %785 = vmatprep.subr.bf16.mxu0 %v745_v35  ;;  %v746_v48 = vpack.c.bf16 %v714_v43, %v710_v63 }
 0x227   :  { %v712_v50 = vld [vmem:[#allocation2 + $0x20] sm:$0xff]  ;;  %v715_v54 = vld [vmem:[#allocation2 + $0x38] sm:$0xff] }
 0x228   :  { %559 = vst [vmem:[#allocation2 + $0x40] sm:$0xf] %v555_v46  ;;  %562 = vst [vmem:[#allocation2 + $0x58] sm:$0xf] %v558_v47  ;;  %v566_v59 = vpop.permute.xlu1 %565  ;;  %v744_v60 = vpack.c.bf16 %v712_v50, %v708_v42  ;;  %v747_v61 = vpack.c.bf16 %v715_v54, %v711_v53  ;;  %v724_v54 = vld [vmem:[#allocation2 + $0x80] sm:$0xff] }
 0x229   :  { %v596_v55 = vpop.permute.xlu0 %595  ;;  %v572_v2 = vsel %vm167_vm3, %v566_v59, %v568_v13  ;;  %v573_v33 = vsel %vm167_vm3, %v564_v22, %v566_v59 }
 0x22a   :  { %v584_v15 = vmul.f32 %v573_v33, %v1199_v62  ;;  %v585_v10 = vmul.f32 %v1192_v58, %v572_v2  ;;  %786 = vmatpush1.bf16.msra.mxu0 %v744_v60  ;;  %826 = vmatprep.subr.bf16.mxu1 %v747_v61 }
 0x22b   :  { %827 = vmatpush1.bf16.msra.mxu1 %v746_v48  ;;  %v717_v27 = vld [vmem:[#allocation2 + $0x48] sm:$0xff]  ;;  %v718_v42 = vld [vmem:[#allocation2 + $0x50] sm:$0xff] }
 0x22c   :  { %588 = vst [vmem:[#allocation2 + $0x68] sm:$0xf] %v584_v15  ;;  %589 = vst [vmem:[#allocation2 + $0x70] sm:$0xf] %v585_v10  ;;  %v570_v7 = vpop.permute.xlu1 %569  ;;  %v726_v10 = vld [vmem:[#allocation2 + $0x90] sm:$0xff] }
 0x22d   :  { %v600_v6 = vpop.permute.xlu0 %599  ;;  %v571_v11 = vsel %vm167_vm3, %v568_v13, %v570_v7  ;;  %v574_v17 = vsel %vm167_vm3, %v570_v7, %v564_v22 }
 0x22e   :  { %v583_v9 = vmul.f32 %v1180_v51, %v574_v17  ;;  %v586_v14 = vmul.f32 %v571_v11, %v1206_v24 }
 0x22f   :  { %v719_v32 = vld [vmem:[#allocation2 + $0x58] sm:$0xff] }
 0x230   :  { %587 = vst [vmem:[#allocation2 + $0x60] sm:$0xf] %v583_v9  ;;  %590 = vst [vmem:[#allocation2 + $0x78] sm:$0xf] %v586_v14  ;;  %v598_v62 = vpop.permute.xlu1 %597 }
 0x231   :  { %v624_v58 = vpop.permute.xlu0 %623  ;;  %v604_v19 = vsel %vm201_vm4, %v598_v62, %v600_v6  ;;  %v605_v20 = vsel %vm201_vm4, %v596_v55, %v598_v62 }
 0x232   :  { %v615_v21 = vmul.f32 %v1221_v36, %v605_v20  ;;  %v616_v18 = vmul.f32 %v604_v19, %v1237_v45  ;;  %v716_v36 = vld [vmem:[#allocation2 + $0x40] sm:$0xff] }
 0x233   :  { %v721_v22 = vld [vmem:[#allocation2 + $0x68] sm:$0xff]  ;;  %v722_v45 = vld [vmem:[#allocation2 + $0x70] sm:$0xff] }
 0x234   :  { %619 = vst [vmem:[#allocation2 + $0xa0] sm:$0xf] %v615_v21  ;;  %620 = vst [vmem:[#allocation2 + $0xa8] sm:$0xf] %v616_v18  ;;  %v602_v24 = vpop.permute.xlu1 %601  ;;  %v749_v23 = vpack.c.bf16 %v721_v22, %v717_v27 }
 0x235   :  { %v628_v51 = vpop.permute.xlu0 %627  ;;  %v603_v28 = vsel %vm201_vm4, %v600_v6, %v602_v24  ;;  %v606_v29 = vsel %vm201_vm4, %v602_v24, %v596_v55  ;;  %v725_v55 = vld [vmem:[#allocation2 + $0x88] sm:$0xff]  ;;  %v727_v6 = vld [vmem:[#allocation2 + $0x98] sm:$0xff] }
 0x236   :  { %v617_v5 = vmul.f32 %v1226_v37, %v603_v28  ;;  %v618_v34 = vmul.f32 %v606_v29, %v1233_v44  ;;  %787 = vmatprep.subr.bf16.mxu0 %v749_v23  ;;  %v750_v44 = vpack.c.bf16 %v722_v45, %v718_v42 }
 0x237   :  { %v720_v13 = vld [vmem:[#allocation2 + $0x60] sm:$0xff]  ;;  %v723_v35 = vld [vmem:[#allocation2 + $0x78] sm:$0xff] }
 0x238   :  { %621 = vst [vmem:[#allocation2 + $0xb0] sm:$0xf] %v617_v5  ;;  %622 = vst [vmem:[#allocation2 + $0xb8] sm:$0xf] %v618_v34  ;;  %v626_v39 = vpop.permute.xlu1 %625  ;;  %v748_v46 = vpack.c.bf16 %v720_v13, %v716_v36  ;;  %v751_v47 = vpack.c.bf16 %v723_v35, %v719_v32 }
 0x239   :  { %v652_v38 = vpop.permute.xlu0 %651  ;;  %v632_v43 = vsel %vm231_vm5, %v626_v39, %v628_v51  ;;  %v633_v37 = vsel %vm231_vm5, %v624_v58, %v626_v39 }
 0x23a   :  { %v643_v50 = vmul.f32 %v1248_v56, %v633_v37  ;;  %v644_v53 = vmul.f32 %v632_v43, %v1268_v26  ;;  %788 = vmatpush1.bf16.msra.mxu0 %v748_v46  ;;  %828 = vmatprep.subr.bf16.mxu1 %v751_v47 }
 0x23b   :  { %829 = vmatpush1.bf16.msra.mxu1 %v750_v44  ;;  %v729_v59 = vld [vmem:[#allocation2 + $0xa8] sm:$0xff]  ;;  %v728_v60 = vld [vmem:[#allocation2 + $0xa0] sm:$0xff] }
 0x23c   :  { %647 = vst [vmem:[#allocation2 + $0xc0] sm:$0xf] %v643_v50  ;;  %648 = vst [vmem:[#allocation2 + $0xc8] sm:$0xf] %v644_v53  ;;  %v630_v63 = vpop.permute.xlu1 %629  ;;  %v753_v2 = vpack.c.bf16 %v729_v59, %v725_v55  ;;  %v752_v33 = vpack.c.bf16 %v728_v60, %v724_v54 }
 0x23d   :  { %v656_v61 = vpop.permute.xlu0 %655  ;;  %v631_v48 = vsel %vm231_vm5, %v628_v51, %v630_v63  ;;  %v634_v56 = vsel %vm231_vm5, %v630_v63, %v624_v58 }
 0x23e   :  { %v645_v26 = vmul.f32 %v1253_v57, %v631_v48  ;;  %v646_v15 = vmul.f32 %v634_v56, %v1264_v25  ;;  %789 = vmatprep.subr.bf16.mxu0 %v753_v2 }
 0x23f   :  { %790 = vmatpush1.bf16.msra.mxu0 %v752_v33  ;;  %v731_v7 = vld [vmem:[#allocation2 + $0xb8] sm:$0xff]  ;;  %v730_v11 = vld [vmem:[#allocation2 + $0xb0] sm:$0xff] }
 0x240   :  { %649 = vst [vmem:[#allocation2 + $0xd0] sm:$0xf] %v645_v26  ;;  %650 = vst [vmem:[#allocation2 + $0xd8] sm:$0xf] %v646_v15  ;;  %v654_v17 = vpop.permute.xlu1 %653  ;;  %v755_v9 = vpack.c.bf16 %v731_v7, %v727_v6  ;;  %v754_v14 = vpack.c.bf16 %v730_v11, %v726_v10 }
 0x241   :  { %v660_v62 = vsel %vm261_vm6, %v654_v17, %v656_v61  ;;  %v661_v58 = vsel %vm261_vm6, %v652_v38, %v654_v17  ;;  %v680_v57 = vpop.permute.xlu0 %679 }
 0x242   :  { %v671_v25 = vmul.f32 %v1283_v49, %v661_v58  ;;  %v672_v19 = vmul.f32 %v660_v62, %v1299_v16  ;;  %830 = vmatprep.subr.bf16.mxu1 %v755_v9 }
 0x243   :  { %831 = vmatpush1.bf16.msra.mxu1 %v754_v14  ;;  %v733_v29 = vld [vmem:[#allocation2 + $0xc8] sm:$0xff]  ;;  %v732_v34 = vld [vmem:[#allocation2 + $0xc0] sm:$0xff] }
 0x244   :  { %675 = vst [vmem:[#allocation2 + $0xe0] sm:$0xf] %v671_v25  ;;  %676 = vst [vmem:[#allocation2 + $0xe8] sm:$0xf] %v672_v19  ;;  %v658_v20 = vpop.permute.xlu1 %657 }
 0x245   :  { %v659_v21 = vsel %vm261_vm6, %v656_v61, %v658_v20  ;;  %v662_v18 = vsel %vm261_vm6, %v658_v20, %v652_v38  ;;  %v684_v51 = vpop.permute.xlu0 %683 }
 0x246   :  { %v673_v27 = vmul.f32 %v1288_v52, %v659_v21  ;;  %v674_v22 = vmul.f32 %v662_v18, %v1295_v12 }
 0x247   :  { %v734_v39 = vld [vmem:[#allocation2 + $0xd0] sm:$0xff] }
 0x248   :  { %677 = vst [vmem:[#allocation2 + $0xf0] sm:$0xf] %v673_v27  ;;  %678 = vst [vmem:[#allocation2 + $0xf8] sm:$0xf] %v674_v22  ;;  %v682_v49 = vpop.permute.xlu1 %681 }
 0x249   :  { %v688_v16 = vsel %vm291_vm7, %v682_v49, %v684_v51  ;;  %v689_v24 = vsel %vm291_vm7, %v680_v57, %v682_v49 }
 0x24a   :  { %v699_v23 = vmul.f32 %v1314_v30, %v689_v24  ;;  %v700_v28 = vmul.f32 %v688_v16, %v1330_v41  ;;  %v735_v41 = vld [vmem:[#allocation2 + $0xd8] sm:$0xff] }
 0x24b   :  { %v737_v5 = vld [vmem:[#allocation2 + $0xe8] sm:$0xff]  ;;  %v736_v52 = vld [vmem:[#allocation2 + $0xe0] sm:$0xff] }
 0x24c   :  { %703 = vst [vmem:[#allocation2 + $0x100] sm:$0xf] %v699_v23  ;;  %704 = vst [vmem:[#allocation2 + $0x108] sm:$0xf] %v700_v28  ;;  %v686_v12 = vpop.permute.xlu1 %685  ;;  %v757_v36 = vpack.c.bf16 %v737_v5, %v733_v29  ;;  %v756_v45 = vpack.c.bf16 %v736_v52, %v732_v34 }
 0x24d   :  { %v687_v13 = vsel %vm291_vm7, %v684_v51, %v686_v12  ;;  %v690_v32 = vsel %vm291_vm7, %v686_v12, %v680_v57 }
 0x24e   :  { %v701_v35 = vmul.f32 %v1319_v31, %v687_v13  ;;  %v702_v30 = vmul.f32 %v690_v32, %v1326_v40  ;;  %791 = vmatprep.subr.bf16.mxu0 %v757_v36  ;;  %v707_v40 = vld [vmem:[%s1507_s2] sm:$0x3] }
 0x24f   :  { %792 = vmatpush1.bf16.msra.mxu0 %v756_v45  ;;  %v739_v38 = vld [vmem:[#allocation2 + $0xf8] sm:$0xff]  ;;  %v738_v46 = vld [vmem:[#allocation2 + $0xf0] sm:$0xff] }
 0x250   :  { %705 = vst [vmem:[#allocation2 + $0x110] sm:$0xf] %v701_v35  ;;  %706 = vst [vmem:[#allocation2 + $0x118] sm:$0xf] %v702_v30  ;;  %v759_v47 = vpack.c.bf16 %v739_v38, %v735_v41  ;;  %v758_v42 = vpack.c.bf16 %v738_v46, %v734_v39 }
 0x252   :  { %832 = vmatprep.subr.bf16.mxu1 %v759_v47 }
 0x253   :  { %833 = vmatpush1.bf16.msra.mxu1 %v758_v42  ;;  %v741_v43 = vld [vmem:[#allocation2 + $0x108] sm:$0xff]  ;;  %v740_v37 = vld [vmem:[#allocation2 + $0x100] sm:$0xff] }
 0x254   :  { %v761_v8 = vpack.c.bf16 %v741_v43, %v741_v43  ;;  %v760_v44 = vpack.c.bf16 %v740_v37, %v740_v37 }
 0x256   :  { %921 = vmatprep.subr.msk.bf16.mxu0 %vm380_vm8, %v761_v8  ;;  %v774_v31 = vsel %vm380_vm8, %v760_v44, 0  ;;  %v768_v60 = vpop.permute.xlu0 %767 }
 0x257   :  { %794 = vmatpush1.bf16.msra.mxu0 %v774_v31  ;;  %v743_v50 = vld [vmem:[#allocation2 + $0x118] sm:$0xff]  ;;  %v742_v53 = vld [vmem:[#allocation2 + $0x110] sm:$0xff] }
 0x258   :  { %v763_v54 = vpack.c.bf16 %v743_v50, %v743_v50  ;;  %v762_v55 = vpack.c.bf16 %v742_v53, %v742_v53 }
 0x25a   :  { %922 = vmatmul.mubr.msk.bf16.vlgmr.msra.gmra.mrb[4].mxu0 %vm376_vm9, %v707_v40  ;;  %923 = vmatprep.subr.msk.bf16.mxu1 %vm380_vm8, %v763_v54  ;;  %v780_v59 = vsel %vm380_vm8, %v762_v55, 0 }
 0x25b   :  { %835 = vmatpush1.bf16.msra.mxu1 %v780_v59 }
 0x25e   :  { %924 = vmatmul.mubr.msk.bf16.vlgmr.msra.gmra.mrb[4].mxu1 %vm376_vm9, %v707_v40 }
 0x32d   :  { %v819_v61 = vpop.f32.mrb[4].mxu0 }
 0x32e   :  { %v820_v63 = vadd.f32 %v819_v61, %v768_v60  ;;  %v821_v2 = vpop.f32.mrb[5].mxu0 }
 0x32f   :  { %v822_v33 = vadd.f32 %v821_v2, %v768_v60  ;;  %v823_v48 = vpop.f32.mrb[6].mxu0 }
 0x330   :  { %v867_v56 = vadd.f32 %v820_v63, %v1007_v1  ;;  %v824_v26 = vpop.f32.mrb[7].mxu0 }
 0x331   :  { %v868_v15 = vadd.f32 %v822_v33, %v1019_v4  ;;  %v860_v10 = vpop.f32.mrb[4].mxu1 }
 0x332   :  { %v871_v6 = vmax.f32 %v867_v56, 0.0  ;;  %v861_v7 = vadd.f32 %v860_v10, %v768_v60  ;;  %v862_v11 = vpop.f32.mrb[5].mxu1 }
 0x333   :  { %v872_v17 = vmax.f32 %v868_v15, 0.0  ;;  %v863_v9 = vadd.f32 %v862_v11, %v768_v60  ;;  %v864_v14 = vpop.f32.mrb[6].mxu1 }
 0x334   :  { %v869_v62 = vadd.f32 %v861_v7, %v1002_v0  ;;  %v865_v58 = vpop.f32.mrb[7].mxu1 }
 0x335   :  { %v879_v57 = vcombine.low %v871_v6, %v872_v17  ;;  %v870_v25 = vadd.f32 %v863_v9, %v1015_v3 }
 0x336   :  { %v873_v19 = vmax.f32 %v869_v62, 0.0 }
 0x337   :  { %883 = vst [vmem:[%s1508_s6] sm:$0xff] %v879_v57  ;;  %v874_v1 = vmax.f32 %v870_v25, 0.0 }
 0x339   :  { %v880_v4 = vcombine.low %v873_v19, %v874_v1 }
 0x33b   :  { %884 = vst [vmem:[%s1508_s6 + $0x8] sm:$0xff] %v880_v4 }

</bundles_post_ra>
